<compile_context>
chip_gen: v7x
topology: tpu7x:2x2x1
jax: 0.10.0
libtpu: 0.0.40
codegen_flags: <defaults>
</compile_context>

<pallas_src>
import jax
import jax.numpy as jnp
import numpy as np
from jax.experimental import pallas as pl
from jax.experimental.pallas import tpu as pltpu


# ----------------------------------------------------------------------------
# Pallas kernel: one (batch, row-tile) per grid step, fully fused, no scratch.
# ----------------------------------------------------------------------------
def gfu_kernel(x_ref, y_ref, k_ref, w1_ref, b1_ref, w2_ref, w3_ref, b3_ref,
               out_ref):
    f32 = jnp.float32

    # conv1 (+ folded BN) + ReLU on this row tile of x_gui
    x1 = jnp.dot(w1_ref[...], x_ref[...], preferred_element_type=f32)   # (Cout, LT)
    x1 = jnp.maximum(x1 + b1_ref[...], 0.0)

    # conv2 (1x1, linear) on the low-res input, then the separable bilinear
    # upsample as ONE lane-dense kron-matrix dot; ReLU after the upsample
    # (exactly the module's op order, since conv2/upsample commute).
    yc = jnp.dot(w2_ref[...], y_ref[...], preferred_element_type=f32)   # (Cout, Hy*Wy)
    y2 = jnp.dot(yc, k_ref[...], preferred_element_type=f32)            # (Cout, LT)
    y2 = jnp.maximum(y2, 0.0)

    # add + conv3 (+ folded BN) + ReLU; single lane-dense store
    out = jnp.dot(w3_ref[...], x1 + y2, preferred_element_type=f32)     # (Cout, LT)
    out_ref[...] = jnp.maximum(out + b3_ref[...], 0.0)


# ----------------------------------------------------------------------------
# Helpers (plain JAX glue)
# ----------------------------------------------------------------------------
def upsample_matrix(out_size: int, in_size: int) -> jnp.ndarray:
    """1-D bilinear interpolation matrix, align_corners=True: (out_size, in_size)."""
    if in_size == 1:
        return jnp.ones((out_size, 1), jnp.float32)
    if out_size == 1:
        return jnp.zeros((1, in_size), jnp.float32).at[0, 0].set(1.0)
    coords = jnp.arange(out_size, dtype=jnp.float32) * (in_size - 1) / (out_size - 1)
    i0 = jnp.clip(jnp.floor(coords).astype(jnp.int32), 0, in_size - 1)
    i1 = jnp.clip(i0 + 1, 0, in_size - 1)
    frac = coords - i0.astype(jnp.float32)
    M = jnp.zeros((out_size, in_size), jnp.float32)
    M = M.at[jnp.arange(out_size), i0].add(1.0 - frac)
    M = M.at[jnp.arange(out_size), i1].add(frac)
    return M


def fold_bn(gamma, beta, mean, var, eps=1e-5):
    scale = gamma / jnp.sqrt(var + eps)
    bias = beta - mean * scale
    return scale, bias                               # (C,), (C,)


def pick_row_tile(H, W, Cl, Cin, Cout, HyWy, budget_bytes=24 << 20):
    """Largest legal row tile whose per-step working set fits the VMEM budget.

    Prefers TH == H (grid collapses over rows).  Otherwise TH must be a
    multiple of 8, divide H, and give a 128-aligned lane extent.
    """
    def working_set(th):
        lt = th * W
        # double-buffered f32 input/output blocks + streamed K tile
        return 4 * (2 * (Cl * lt + Cin * HyWy + HyWy * lt) + 2 * Cout * lt)

    if working_set(H) <= budget_bytes:
        return H
    cands = [d for d in range(8, H, 8)
             if H % d == 0 and (d * W) % 128 == 0 and working_set(d) <= budget_bytes]
    return max(cands) if cands else H


def global_feature_upsample(x_gui_nchw, y_high_nchw, params):
    """x_gui: (N, C_low, H, W) f32; y_high: (N, C_in, Hy, Wy) f32 -> (N, C_out, H, W)."""
    N, Cl, H, W = x_gui_nchw.shape
    _, Cin, Hy, Wy = y_high_nchw.shape
    Cout = params["w1"].shape[0]
    HW, HyWy = H * W, Hy * Wy

    TH = pick_row_tile(H, W, Cl, Cin, Cout, HyWy)
    T = H // TH
    LT = TH * W

    # NCHW -> (N, C, H*W): free reshapes only (no transposes in this layout).
    x2d = x_gui_nchw.reshape(N, Cl, HW)
    y2d = y_high_nchw.reshape(N, Cin, HyWy)

    # Separable bilinear interpolation weights (align_corners=True) fused into
    # one kron matrix K: K[hy*Wy + wy, h*W + w] = Wh[h, hy] * Ww[w, wy].
    Wh = upsample_matrix(H, Hy)                      # (H, Hy)
    Ww = upsample_matrix(W, Wy)                      # (W, Wy)
    K = (Wh.T[:, None, :, None] * Ww.T[None, :, None, :]).reshape(HyWy, HW)

    # fold eval-mode BN into conv weights / bias
    s1, b1 = fold_bn(params["bn1_g"], params["bn1_b"], params["bn1_m"], params["bn1_v"])
    s3, b3 = fold_bn(params["bn3_g"], params["bn3_b"], params["bn3_m"], params["bn3_v"])
    w1s = params["w1"] * s1[:, None]                 # (Cout, Cl)
    w3s = params["w3"] * s3[:, None]                 # (Cout, Cout)
    b1c = b1[:, None]                                # (Cout, 1)
    b3c = b3[:, None]                                # (Cout, 1)

    shared = lambda b, i: (0, 0)                     # weights resident across the grid

    flops = 2 * N * (HW * Cout * Cl                  # conv1
                     + HyWy * Cout * Cin             # conv2 (low-res)
                     + HW * Cout * HyWy              # kron-dot upsample
                     + HW * Cout * Cout)             # conv3
    bytes_accessed = 4 * (N * Cl * HW + N * Cin * HyWy + N * HyWy * HW
                          + N * Cout * HW
                          + Cout * (Cl + Cin + Cout + 2))

    out2d = pl.pallas_call(
        gfu_kernel,
        out_shape=jax.ShapeDtypeStruct((N, Cout, HW), jnp.float32),
        grid_spec=pltpu.PrefetchScalarGridSpec(
            num_scalar_prefetch=0,
            grid=(N, T),
            in_specs=[
                pl.BlockSpec((None, Cl, LT), lambda b, i: (b, 0, i)),      # x_gui row tile
                pl.BlockSpec((None, Cin, HyWy), lambda b, i: (b, 0, 0)),   # full low-res y
                pl.BlockSpec((HyWy, LT), lambda b, i: (0, i)),             # kron upsample tile
                pl.BlockSpec((Cout, Cl), shared),                          # W1 (BN-scaled)
                pl.BlockSpec((Cout, 1), shared),                           # bn1 bias
                pl.BlockSpec((Cout, Cin), shared),                         # W2
                pl.BlockSpec((Cout, Cout), shared),                        # W3 (BN-scaled)
                pl.BlockSpec((Cout, 1), shared),                           # bn3 bias
            ],
            out_specs=pl.BlockSpec((None, Cout, LT), lambda b, i: (b, 0, i)),
        ),
        compiler_params=pltpu.CompilerParams(
            dimension_semantics=("parallel", "parallel"),
            vmem_limit_bytes=48 * 1024 * 1024),
        cost_estimate=pl.CostEstimate(flops=int(flops), transcendentals=0,
                                      bytes_accessed=int(bytes_accessed)),
    )(x2d, y2d, K, w1s, b1c, params["w2"], w3s, b3c)

    # (N, Cout, H*W) -> NCHW, pure reshape
    return out2d.reshape(N, Cout, H, W)


# ----------------------------------------------------------------------------
# Pure-JAX reference (original module op order) for a sanity check
# ----------------------------------------------------------------------------
def reference(x_gui_nchw, y_high_nchw, params):
    Wh = upsample_matrix(x_gui_nchw.shape[2], y_high_nchw.shape[2])
    Ww = upsample_matrix(x_gui_nchw.shape[3], y_high_nchw.shape[3])
    s1, b1 = fold_bn(params["bn1_g"], params["bn1_b"], params["bn1_m"], params["bn1_v"])
    s3, b3 = fold_bn(params["bn3_g"], params["bn3_b"], params["bn3_m"], params["bn3_v"])
    y_up = jnp.einsum("hy,ncyv,wv->nchw", Wh, y_high_nchw, Ww)
    x1 = jnp.einsum("oc,nchw->nohw", params["w1"], x_gui_nchw)
    x1 = jnp.maximum(x1 * s1[None, :, None, None] + b1[None, :, None, None], 0.0)
    y2 = jnp.maximum(jnp.einsum("oc,nchw->nohw", params["w2"], y_up), 0.0)
    out = jnp.einsum("oc,nchw->nohw", params["w3"], x1 + y2)
    return jnp.maximum(out * s3[None, :, None, None] + b3[None, :, None, None], 0.0)


# ----------------------------------------------------------------------------
if __name__ == "__main__":
    # Module config (small): low_channels=4, in_channels=8, out_channels=4
    N, Cl, Cin, Cout = 2, 4, 8, 4
    H, W = 16, 16          # x_gui spatial (target size)
    Hy, Wy = 8, 8          # y_high spatial (to be upsampled)

    key = jax.random.PRNGKey(0)
    k = jax.random.split(key, 12)

    x_gui = jax.random.normal(k[0], (N, Cl, H, W), jnp.float32)
    y_high = jax.random.normal(k[1], (N, Cin, Hy, Wy), jnp.float32)

    # Deterministic synthetic parameters (the 1x1 convs have no bias).
    # Conv weights stored as (C_out, C_in) == PyTorch (C_out, C_in, 1, 1) squeezed.
    params = {
        "w1": 0.3 * jax.random.normal(k[2], (Cout, Cl), jnp.float32),
        "w2": 0.3 * jax.random.normal(k[3], (Cout, Cin), jnp.float32),
        "w3": 0.3 * jax.random.normal(k[4], (Cout, Cout), jnp.float32),
        # BatchNorm folded in eval mode (running statistics).
        "bn1_g": 1.0 + 0.1 * jax.random.normal(k[5], (Cout,), jnp.float32),
        "bn1_b": 0.1 * jax.random.normal(k[6], (Cout,), jnp.float32),
        "bn1_m": 0.05 * jax.random.normal(k[7], (Cout,), jnp.float32),
        "bn1_v": 1.0 + 0.1 * jax.nn.softplus(jax.random.normal(k[8], (Cout,), jnp.float32)),
        "bn3_g": 1.0 + 0.1 * jax.random.normal(k[9], (Cout,), jnp.float32),
        "bn3_b": 0.1 * jax.random.normal(k[10], (Cout,), jnp.float32),
        "bn3_m": 0.05 * jax.random.normal(k[11], (Cout,), jnp.float32),
        "bn3_v": jnp.ones((Cout,), jnp.float32) * 1.2,
    }

    out = jax.block_until_ready(global_feature_upsample(x_gui, y_high, params))
    ref = jax.block_until_ready(reference(x_gui, y_high, params))

    assert out.shape == (N, Cout, H, W), out.shape
    np.testing.assert_allclose(np.asarray(out), np.asarray(ref), rtol=1e-5, atol=1e-5)
    print("KERNEL_OK")
</pallas_src>

<mosaic_0001>
module attributes {stable_mosaic.version = 11 : i64} {
  func.func @gfu_kernel(%arg0: i32, %arg1: i32, %arg2: memref<1x4x256xf32, #tpu.memory_space<vmem>>, %arg3: memref<1x8x64xf32, #tpu.memory_space<vmem>>, %arg4: memref<64x256xf32, #tpu.memory_space<vmem>>, %arg5: memref<4x4xf32, #tpu.memory_space<vmem>>, %arg6: memref<4x1xf32, #tpu.memory_space<vmem>>, %arg7: memref<4x8xf32, #tpu.memory_space<vmem>>, %arg8: memref<4x4xf32, #tpu.memory_space<vmem>>, %arg9: memref<4x1xf32, #tpu.memory_space<vmem>>, %arg10: memref<1x4x256xf32, #tpu.memory_space<vmem>>) attributes {dimension_semantics = [#tpu.dimension_semantics<parallel>, #tpu.dimension_semantics<parallel>], iteration_bounds = array<i64: 2, 1>, scalar_prefetch = 0 : i64, scratch_operands = 0 : i64, tpu.core_type = #tpu.core_type<tc>, window_params = [{transform_indices = @transform_0, window_bounds = array<i64: 1, 4, 256>}, {transform_indices = @transform_1, window_bounds = array<i64: 1, 8, 64>}, {transform_indices = @transform_2, window_bounds = array<i64: 64, 256>}, {pipeline_mode = #tpu.pipeline_mode<synchronous>, transform_indices = @transform_3, window_bounds = array<i64: 4, 4>}, {pipeline_mode = #tpu.pipeline_mode<synchronous>, transform_indices = @transform_4, window_bounds = array<i64: 4, 1>}, {pipeline_mode = #tpu.pipeline_mode<synchronous>, transform_indices = @transform_5, window_bounds = array<i64: 4, 8>}, {pipeline_mode = #tpu.pipeline_mode<synchronous>, transform_indices = @transform_6, window_bounds = array<i64: 4, 4>}, {pipeline_mode = #tpu.pipeline_mode<synchronous>, transform_indices = @transform_7, window_bounds = array<i64: 4, 1>}, {transform_indices = @transform_8, window_bounds = array<i64: 1, 4, 256>}]} {
    %c0 = arith.constant 0 : index
    %c0_0 = arith.constant 0 : index
    %0 = vector.load %arg5[%c0, %c0_0] : memref<4x4xf32, #tpu.memory_space<vmem>>, vector<4x4xf32>
    %c0_1 = arith.constant 0 : index
    %c0_2 = arith.constant 0 : index
    %c0_3 = arith.constant 0 : index
    %1 = vector.load %arg2[%c0_1, %c0_2, %c0_3] : memref<1x4x256xf32, #tpu.memory_space<vmem>>, vector<1x4x256xf32>
    %2 = vector.shape_cast %1 : vector<1x4x256xf32> to vector<4x256xf32>
    %cst = arith.constant dense<0.000000e+00> : vector<4x256xf32>
    %3 = tpu.matmul %0, %2, %cst {dimension_numbers = #tpu.dot_dimension_numbers<[1], [0], [0], [1], [0, 0, 1, 1], [], []>} : vector<4x4xf32>, vector<4x256xf32>, vector<4x256xf32> -> vector<4x256xf32>
    %c0_4 = arith.constant 0 : index
    %c0_5 = arith.constant 0 : index
    %4 = vector.load %arg6[%c0_4, %c0_5] : memref<4x1xf32, #tpu.memory_space<vmem>>, vector<4x1xf32>
    %5 = vector.broadcast %4 : vector<4x1xf32> to vector<4x256xf32>
    %6 = arith.addf %3, %5 : vector<4x256xf32>
    %cst_6 = arith.constant 0.000000e+00 : f32
    %7 = vector.broadcast %cst_6 : f32 to vector<4x256xf32>
    %8 = arith.maximumf %6, %7 : vector<4x256xf32>
    %c0_7 = arith.constant 0 : index
    %c0_8 = arith.constant 0 : index
    %9 = vector.load %arg7[%c0_7, %c0_8] : memref<4x8xf32, #tpu.memory_space<vmem>>, vector<4x8xf32>
    %c0_9 = arith.constant 0 : index
    %c0_10 = arith.constant 0 : index
    %c0_11 = arith.constant 0 : index
    %10 = vector.load %arg3[%c0_9, %c0_10, %c0_11] : memref<1x8x64xf32, #tpu.memory_space<vmem>>, vector<1x8x64xf32>
    %11 = vector.shape_cast %10 : vector<1x8x64xf32> to vector<8x64xf32>
    %cst_12 = arith.constant dense<0.000000e+00> : vector<4x64xf32>
    %12 = tpu.matmul %9, %11, %cst_12 {dimension_numbers = #tpu.dot_dimension_numbers<[1], [0], [0], [1], [0, 0, 1, 1], [], []>} : vector<4x8xf32>, vector<8x64xf32>, vector<4x64xf32> -> vector<4x64xf32>
    %c0_13 = arith.constant 0 : index
    %c0_14 = arith.constant 0 : index
    %13 = vector.load %arg4[%c0_13, %c0_14] : memref<64x256xf32, #tpu.memory_space<vmem>>, vector<64x256xf32>
    %cst_15 = arith.constant dense<0.000000e+00> : vector<4x256xf32>
    %14 = tpu.matmul %12, %13, %cst_15 {dimension_numbers = #tpu.dot_dimension_numbers<[1], [0], [0], [1], [0, 0, 1, 1], [], []>} : vector<4x64xf32>, vector<64x256xf32>, vector<4x256xf32> -> vector<4x256xf32>
    %cst_16 = arith.constant 0.000000e+00 : f32
    %15 = vector.broadcast %cst_16 : f32 to vector<4x256xf32>
    %16 = arith.maximumf %14, %15 : vector<4x256xf32>
    %c0_17 = arith.constant 0 : index
    %c0_18 = arith.constant 0 : index
    %17 = vector.load %arg8[%c0_17, %c0_18] : memref<4x4xf32, #tpu.memory_space<vmem>>, vector<4x4xf32>
    %18 = arith.addf %8, %16 : vector<4x256xf32>
    %cst_19 = arith.constant dense<0.000000e+00> : vector<4x256xf32>
    %19 = tpu.matmul %17, %18, %cst_19 {dimension_numbers = #tpu.dot_dimension_numbers<[1], [0], [0], [1], [0, 0, 1, 1], [], []>} : vector<4x4xf32>, vector<4x256xf32>, vector<4x256xf32> -> vector<4x256xf32>
    %c0_20 = arith.constant 0 : index
    %c0_21 = arith.constant 0 : index
    %20 = vector.load %arg9[%c0_20, %c0_21] : memref<4x1xf32, #tpu.memory_space<vmem>>, vector<4x1xf32>
    %21 = vector.broadcast %20 : vector<4x1xf32> to vector<4x256xf32>
    %22 = arith.addf %19, %21 : vector<4x256xf32>
    %cst_22 = arith.constant 0.000000e+00 : f32
    %23 = vector.broadcast %cst_22 : f32 to vector<4x256xf32>
    %24 = arith.maximumf %22, %23 : vector<4x256xf32>
    %c0_23 = arith.constant 0 : index
    %c0_24 = arith.constant 0 : index
    %c0_25 = arith.constant 0 : index
    %25 = vector.load %arg10[%c0_23, %c0_24, %c0_25] : memref<1x4x256xf32, #tpu.memory_space<vmem>>, vector<1x4x256xf32>
    %26 = vector.shape_cast %25 : vector<1x4x256xf32> to vector<4x256xf32>
    %27 = vector.shape_cast %24 : vector<4x256xf32> to vector<1x4x256xf32>
    tpu.vector_store %arg10[%c0_23, %c0_24, %c0_25], %27 {strides = array<i32>} : memref<1x4x256xf32, #tpu.memory_space<vmem>>, vector<1x4x256xf32>,
    return
  }
  func.func @transform_0(%arg0: i32, %arg1: i32) -> (i32, i32, i32) {
    %c0_i32 = arith.constant 0 : i32
    %c0_i32_0 = arith.constant 0 : i32
    return %arg0, %c0_i32, %arg1 : i32, i32, i32
  }
  func.func @transform_1(%arg0: i32, %arg1: i32) -> (i32, i32, i32) {
    %c0_i32 = arith.constant 0 : i32
    %c0_i32_0 = arith.constant 0 : i32
    %c0_i32_1 = arith.constant 0 : i32
    return %arg0, %c0_i32, %c0_i32_0 : i32, i32, i32
  }
  func.func @transform_2(%arg0: i32, %arg1: i32) -> (i32, i32) {
    %c0_i32 = arith.constant 0 : i32
    %c0_i32_0 = arith.constant 0 : i32
    return %c0_i32, %arg1 : i32, i32
  }
  func.func @transform_3(%arg0: i32, %arg1: i32) -> (i32, i32) {
    %c0_i32 = arith.constant 0 : i32
    %c0_i32_0 = arith.constant 0 : i32
    %c0_i32_1 = arith.constant 0 : i32
    return %c0_i32, %c0_i32_0 : i32, i32
  }
  func.func @transform_4(%arg0: i32, %arg1: i32) -> (i32, i32) {
    %c0_i32 = arith.constant 0 : i32
    %c0_i32_0 = arith.constant 0 : i32
    %c0_i32_1 = arith.constant 0 : i32
    return %c0_i32, %c0_i32_0 : i32, i32
  }
  func.func @transform_5(%arg0: i32, %arg1: i32) -> (i32, i32) {
    %c0_i32 = arith.constant 0 : i32
    %c0_i32_0 = arith.constant 0 : i32
    %c0_i32_1 = arith.constant 0 : i32
    return %c0_i32, %c0_i32_0 : i32, i32
  }
  func.func @transform_6(%arg0: i32, %arg1: i32) -> (i32, i32) {
    %c0_i32 = arith.constant 0 : i32
    %c0_i32_0 = arith.constant 0 : i32
    %c0_i32_1 = arith.constant 0 : i32
    return %c0_i32, %c0_i32_0 : i32, i32
  }
  func.func @transform_7(%arg0: i32, %arg1: i32) -> (i32, i32) {
    %c0_i32 = arith.constant 0 : i32
    %c0_i32_0 = arith.constant 0 : i32
    %c0_i32_1 = arith.constant 0 : i32
    return %c0_i32, %c0_i32_0 : i32, i32
  }
  func.func @transform_8(%arg0: i32, %arg1: i32) -> (i32, i32, i32) {
    %c0_i32 = arith.constant 0 : i32
    %c0_i32_0 = arith.constant 0 : i32
    return %arg0, %c0_i32, %arg1 : i32, i32, i32
  }
}

</mosaic_0001>

<bundles_post_ra>
// kernel: tpu_custom_call.1
= control target key start
LH: loop header
LB: loop body
LE: loop exit
PB: predicated region body
PF: predicated region fallthrough
CT: control target
= control target key end

     0   :  { %s1538_s0 = inlined_call_operand.hbm [shape: f32[2,4,256], index: 0, kind: input, shape index: {}]   ;;  %s1539_s1 = inlined_call_operand.hbm [shape: f32[2,8,64], index: 1, kind: input, shape index: {}]   ;;  %s1540_s2 = inlined_call_operand.hbm [shape: f32[64,256], index: 2, kind: input, shape index: {}]   ;;  %s1541_s3 = inlined_call_operand.vmem [shape: f32[4,4], index: 3, kind: input, shape index: {}]   ;;  %s1542_s4 = inlined_call_operand.vmem [shape: f32[4,1], index: 4, kind: input, shape index: {}]   ;;  %s1543_s5 = inlined_call_operand.vmem [shape: f32[4,8], index: 5, kind: input, shape index: {}]   ;;  %s1544_s6 = inlined_call_operand.vmem [shape: f32[4,4], index: 6, kind: input, shape index: {}]   ;;  %s1545_s7 = inlined_call_operand.vmem [shape: f32[4,1], index: 7, kind: input, shape index: {}]   ;;  %s1546_s8 = inlined_call_operand.hbm [shape: f32[2,4,256], index: 8, kind: output, shape index: {}]  }
   0x1   :  { %1556 = sst [smem:[#allocation19_spill]] %s1540_s2 }
   0x2   :  { %13 = vsyncpa [#allocation3], 0 }
   0x3   :  { %15 = vsyncpa [#allocation3 + $0x1], 0 }
   0x4   :  { %16 = vsyncpa [#allocation6], 0 }
   0x5   :  { %18 = vsyncpa [#allocation6 + $0x1], 0 }
   0x6   :  { %19 = vsyncpa [#allocation4], 0 }
   0x7   :  { %21 = vsyncpa [#allocation4 + $0x1], 0  ;;  %s1266_s27 = smov 0   ;;  %s1268_s28 = smov 0  }
   0x8   :  { %s1270_s29 = smov 0   ;;  %s1272_s30 = smov 0  }
   0x9   :  { %s1274_s9 = smov 0   ;;  %s1276_s10 = smov 0  }
   0xa LB: > { %1557 = sst [smem:[#allocation13_spill]] %s1190_s27  ;;  %s1297_s11 = sadd.s32 4294967295, %s1210_s10   ;;  %s1210_s10 = sphi %s1276_s10, %s27_s10   ;;  %s1206_s9 = sphi %s1274_s9, %s1584_s9   ;;  %s1202_s30 = sphi %s1272_s30, %s1583_s30   ;;  %s1198_s29 = sphi %s1270_s29, %s1582_s29   ;;  %s1194_s28 = sphi %s1268_s28, %s1586_s28   ;;  %s1190_s27 = sphi %s1266_s27, %s1585_s27  }
   0xb   : > { %1558 = sst [smem:[#allocation14_spill]] %s1198_s29  ;;  %s895_s12 = sadd.s32 4294967294, %s1210_s10  }
   0xc   : > { %1559 = sst [smem:[#allocation15_spill]] %s1206_s9  ;;  %p61_p0 = scmp.ne.s32.totalorder %s1194_s28, %s1190_s27 }
   0xd   : > { %p1547_p1 = scmp.eq.s32.totalorder %s1297_s11, 0  ;;  %p250_p3 = scmp.eq.s32.totalorder %s895_s12, 1 }
   0xe   : > { %p896_p5 = scmp.ge.s32.totalorder %s1210_s10, 1  ;;  %p257_p7 = scmp.lt.s32.totalorder %s1210_s10, 3 }
   0xf   : > { %p1306_p4 = por %p1547_p1, %p61_p0  ;;  %p1311_p6 = por %p250_p3, %p61_p0 }
  0x10   : > { %p1316_p8 = pnand %p896_p5, %p257_p7  ;;  %s1212_s16 = smov [#allocation7]  }
  0x11   : > { %s1560_s13 = scalar_select %p1306_p4, 1, 0 }
  0x12   : > { %s1561_s14 = scalar_select %p1311_p6, 1, 0 }
  0x13   : > { %s1563_s15 = scalar_select %p1316_p8, 1, 0 }
  0x14   : > { %1562 = sst [smem:[#allocation16_spill]] %s1561_s14  ;;  %s272_s17 = sshll.u32 %s1212_s16, 4  ;;  %s273_s17 = int_to_ptr.vmem [resolvable:$true] %s272_s17 }
  0x15   : > { %p957_p9 = pneg %p1316_p8  ;;  %s39_s19 = sadd.s32 1, %s1206_s9 }
  0x16   : > { %s1565_s2 = sld [smem:[#allocation19_spill]] }
  0x17   : > { %p1325_p11 = pnand %p957_p9, %p1547_p1 }
  0x19   : > { %p1034_p13 = pneg %p1325_p11 }
  0x1c   : > { %s1032_s22 = scalar_lea.hbm %s1565_s2, 2048 }
  0x1d   : > { %p1033_p12 = scmp.ne.s32.totalorder %s1565_s2, %s1032_s22  ;;  %p1039_p5 = scmp.lt.u32.totalorder %s1032_s22, %s1565_s2 }
  0x1f   : > { %p1035_p0 = pnand %p1034_p13, %p1033_p12 }
  0x21   : > { %p1036_p3 = pneg %p1035_p0 }
  0x23   : > { %p1041_p7 = pnand %p1039_p5, %p1036_p3 }
  0x25   : > { %1044 = shalt.err (!%p1041_p7)
}
  0x26   : > { %s1045_s12 = scalar_lea.vmem %s273_s17, 2048  ;;  %p1053_p2 = scmp.lt.s32.totalorder %s273_s17, %s273_s17 }
  0x27   : > { %p1046_p9 = scmp.ne.s32.totalorder %s273_s17, %s1045_s12  ;;  %p1054_p6 = scmp.lt.s32.totalorder %s1045_s12, %s1045_s12 }
  0x29   : > { %p1048_p10 = pnand %p1046_p9, %p1034_p13  ;;  %p1055_p4 = por %p1054_p6, %p1053_p2 }
  0x2b   : > { %p1049_p1 = pneg %p1048_p10 }
  0x2d   : > { %p1056_p8 = pnand %p1055_p4, %p1049_p1 }
  0x2f   : > { %1059 = shalt.err (!%p1056_p8)
}
  0x30   : > { %s1213_s16 = smov 256   ;;  %s1214_s20 = smov 16  }
  0x31   : > { %960 = dma.hbm_to_vmem [thread:$0]  (!%p1325_p11), %s1565_s2, 2048, %s273_s17, [#allocation6], %s1213_s16, %s1213_s16, %s1214_s20  }
  0x32   : > { %p41_p1 = scmp.ge.s32.totalorder %s39_s19, 2  ;;  %s48_s23 = sadd.s32 1, %s1198_s29 }
  0x33   : > { %p55_p2 = scmp.ne.s32.totalorder %s1198_s29, %s1194_s28  ;;  %p56_p4 = scmp.eq.s32.totalorder %s1210_s10, 0 }
  0x34   : > { %s1588_s19 = smov (%p41_p1, %s39_s19), 0  ;;  %p1568_p8 = scmp.eq.s32.totalorder %s1297_s11, 1 }
  0x35   : > { %1566 = sst [smem:[#allocation17_spill]] %s1588_s19  ;;  %p1352_p6 = por %p56_p4, %p55_p2 }
  0x36   : > { %p1358_p10 = por %p1568_p8, %p55_p2  ;;  %s43_s25 = ssub.s32 %s1206_s9, %s1588_s19 }
  0x37   : > { %p973_p11 = scmp.lt.s32.totalorder %s1210_s10, 2  ;;  %p46_p12 = scmp.eq.s32.totalorder %s43_s25, 0 }
  0x38   : > { %s1569_s18 = scalar_select %p1358_p10, 1, 0 }
  0x39   : > { %s301_s17 = sand.u32 1, %s1198_s29   ;;  %s922_s16 = sshll.u32 %s1206_s9, 7 }
  0x3a   : > { %s1366_s26 = sshll.u32 %s301_s17, 3  ;;  %s1375_s22 = scalar_lea.hbm %s1538_s0, %s922_s16 }
  0x3b   : > { %s1369_s12 = scalar_select %p46_p12, %s1198_s29, %s48_s23  }
  0x3c   : > { %s305_s2 = scalar_lea.vmem [#allocation2], %s1366_s26  ;;  %p1382_p13 = pnand %p973_p11, %p1352_p6 }
  0x3d   : > { %1570 = sst [smem:[#allocation18_spill]] %s1369_s12  ;;  %s315_s19 = sshll.u32 %s305_s2, 4  ;;  %s1378_s19 = int_to_ptr.vmem [resolvable:$true] %s315_s19 }
  0x3e   : > { %s1389_s20 = scalar_lea.hbm %s1539_s1, %s922_s16  ;;  %s322_s21 = sand.u32 1, %s1210_s10  }
  0x3f   : > { %s302_s12 = scalar_lea.sflag [#allocation3], %s301_s17  ;;  %s1060_s29 = scalar_lea.hbm %s1375_s22, 128 }
  0x40   : > { %p1061_p0 = scmp.ne.s32.totalorder %s1375_s22, %s1060_s29  ;;  %p1062_p3 = pneg %p1382_p13 }
  0x41   : > { %s1065_s14 = scalar_lea.hbm %s1538_s0, 256  ;;  %p1066_p9 = scmp.lt.u32.totalorder %s1375_s22, %s1538_s0 }
  0x42   : > { %p1063_p5 = pnand %p1062_p3, %p1061_p0  ;;  %p1067_p1 = scmp.lt.u32.totalorder %s1065_s14, %s1060_s29 }
  0x43   : > { %p1069_p4 = scmp.lt.u32.totalorder %s1060_s29, %s1375_s22 }
  0x44   : > { %p1064_p7 = pneg %p1063_p5  ;;  %p1068_p2 = por %p1067_p1, %p1066_p9 }
  0x46   : > { %p1070_p6 = por %p1069_p4, %p1068_p2 }
  0x48   : > { %p1071_p8 = pnand %p1070_p6, %p1064_p7 }
  0x4a   : > { %1074 = shalt.err (!%p1071_p8)
}
  0x4b   : > { %s1075_s17 = scalar_lea.vmem %s1378_s19, 128  ;;  %s1215_s16 = smov [#allocation2]  }
  0x4c   : > { %p1076_p11 = scmp.ne.s32.totalorder %s1378_s19, %s1075_s17  ;;  %s1080_s23 = sshll.u32 %s1215_s16, 4  ;;  %s1081_s23 = int_to_ptr.vmem [resolvable:$false] %s1080_s23 }
  0x4d   : > { %s1082_s27 = scalar_lea.vmem %s1081_s23, 256  ;;  %p1083_p5 = scmp.lt.s32.totalorder %s1378_s19, %s1081_s23 }
  0x4e   : > { %p1078_p12 = pnand %p1076_p11, %p1062_p3  ;;  %p1084_p9 = scmp.lt.s32.totalorder %s1082_s27, %s1075_s17 }
  0x50   : > { %p1079_p0 = pneg %p1078_p12  ;;  %p1085_p1 = por %p1084_p9, %p1083_p5 }
  0x52   : > { %p1086_p2 = pnand %p1085_p1, %p1079_p0 }
  0x54   : > { %1089 = shalt.err (!%p1086_p2)
}
  0x55   : > { %964 = dma.hbm_to_vmem [thread:$0]  (!%p1382_p13), %s1375_s22, 128, %s1378_s19, %s302_s12  }
  0x56   : > { %s326_s29 = scalar_lea.vmem [#allocation5], %s1366_s26  ;;  %s323_s2 = scalar_lea.sflag [#allocation6], %s322_s21 }
  0x57   : > { %s333_s14 = sshll.u32 %s326_s29, 4  ;;  %s1090_s24 = scalar_lea.hbm %s1389_s20, 128  ;;  %s334_s14 = int_to_ptr.vmem [resolvable:$true] %s333_s14 }
  0x58   : > { %p1091_p7 = scmp.ne.s32.totalorder %s1389_s20, %s1090_s24  ;;  %s1095_s16 = scalar_lea.hbm %s1539_s1, 256 }
  0x59   : > { %p1096_p8 = scmp.lt.u32.totalorder %s1389_s20, %s1539_s1  ;;  %p1097_p11 = scmp.lt.u32.totalorder %s1095_s16, %s1090_s24 }
  0x5a   : > { %p1093_p4 = pnand %p1091_p7, %p1062_p3  ;;  %p1099_p0 = scmp.lt.u32.totalorder %s1090_s24, %s1389_s20 }
  0x5b   : > { %p1098_p12 = por %p1097_p11, %p1096_p8 }
  0x5c   : > { %p1094_p6 = pneg %p1093_p4 }
  0x5d   : > { %p1100_p5 = por %p1099_p0, %p1098_p12 }
  0x5f   : > { %p1101_p9 = pnand %p1100_p5, %p1094_p6 }
  0x61   : > { %1104 = shalt.err (!%p1101_p9)
}
  0x62   : > { %s1105_s19 = scalar_lea.vmem %s334_s14, 128  ;;  %s1216_s26 = smov [#allocation5]  }
  0x63   : > { %p1106_p1 = scmp.ne.s32.totalorder %s334_s14, %s1105_s19  ;;  %s1110_s12 = sshll.u32 %s1216_s26, 4  ;;  %s1111_s12 = int_to_ptr.vmem [resolvable:$false] %s1110_s12 }
  0x64   : > { %s1112_s22 = scalar_lea.vmem %s1111_s12, 256  ;;  %p1113_p4 = scmp.lt.s32.totalorder %s334_s14, %s1111_s12 }
  0x65   : > { %p1108_p2 = pnand %p1106_p1, %p1062_p3  ;;  %p1114_p10 = scmp.lt.s32.totalorder %s1112_s22, %s1105_s19 }
  0x67   : > { %p1109_p7 = pneg %p1108_p2  ;;  %p1115_p8 = por %p1114_p10, %p1113_p4 }
  0x69   : > { %p1116_p11 = pnand %p1115_p8, %p1109_p7 }
  0x6b   : > { %1119 = shalt.err (!%p1116_p11)
}
  0x6c   : > { %967 = dma.hbm_to_vmem [thread:$0]  (!%p1382_p13), %s1389_s20, 128, %s334_s14, %s323_s2  }
  0x6d   : > { %p1572_p6 = scmp.ne.s32.totalorder %s1563_s15, 0 }
  0x6e   : > { %s1442_s21 = sand.u32 (!%p1572_p6), 1, %s1194_s28   ;;  %p1573_p10 = scmp.ne.s32.totalorder (!%p1572_p6), %s1560_s13, 0 }
  0x6f   : > { %342 = sbr.rel (%p1572_p6) target bundleno = 798 (0x31e), region = 52  ;;  %s1445_s29 = sshll.u32 (!%p1572_p6), %s1442_s21, 3 }
  0x70   : > { %s345_s24 = scalar_lea.sflag (!%p1572_p6), [#allocation3], %s1442_s21  ;;  %s348_s9 = scalar_lea.vmem (!%p1572_p6), [#allocation2], %s1445_s29 }
  0x76   : > { %1173 = dma.done.wait (%p1573_p10), %s345_s24, 128  }
  0x77   : > { %1175 = vsyncadd (%p1573_p10), %s345_s24, 4294967168  ;;  %s353_s15 = sand.u32 1, %s1297_s11   ;;  %s357_s20 = scalar_lea.vmem [#allocation5], %s1445_s29 }
  0x78   : > { %s354_s25 = scalar_lea.sflag [#allocation6], %s353_s15 }
  0x79   : > { %1177 = dma.done.wait (%p1573_p10), %s354_s25, 128  }
  0x7a   : > { %1179 = vsyncadd (%p1573_p10), %s354_s25, 4294967168  ;;  %p1574_p13 = scmp.eq.s32.totalorder %s1297_s11, 0 }
  0x7c   : > { %1181 = dma.done.wait (%p1574_p13), [#allocation6], 2048   ;;  %p1575_p3 = pmov %p1574_p13 }
  0x7d   : > { %v1217_v0 = vmov 0.0   ;;  %v1218_v1 = vmov 0   ;;  %v403_v2 = vld [vmem:[%s348_s9] sm:$0xff]  ;;  %vm416_vm0 = vcmask 1043456   ;;  %vm412_vm1 = vcmask 31744   ;;  %v573_v7 = vld [vmem:[#allocation7 + $0x18] sm:$0xff] }
  0x7e   : > { %1183 = vsyncadd (%p1575_p3), [#allocation6], 4294965248  ;;  %485 = vmatprep.mubr.f32.mxu1 %v1217_v0  ;;  %654 = vmatprep.mubr.f32.mxu0 %v1217_v0  ;;  %v411_v3 = vcombine.high %v403_v2, %v403_v2  ;;  %v402_v4 = vld [vmem:[%s1541_s3] sm:$0xf]  ;;  %v571_v6 = vld [vmem:[#allocation7 + $0x8] sm:$0xff]  ;;  %vm1219_vm2 = vmmov 0  }
  0x7f   : > { %1030 = vset.pattern.permute.xlu0 %v1218_v1  ;;  %v404_v5 = vld [vmem:[%s1542_s4] sm:$0xf]  ;;  %v572_v9 = vld [vmem:[#allocation7 + $0x10] sm:$0xff]  ;;  %v931_v11 = vpack.c.bf16 %v573_v7, %v571_v6  ;;  %v575_v12 = vld [vmem:[#allocation7 + $0x28] sm:$0xff]  ;;  %vm496_vm3 = vcmask 64512   ;;  %vm586_vm4 = vcmask 523264  }
  0x80   : > { %407 = vperm.xlu0 %1030, %v404_v5   ;;  %v570_v8 = vld [vmem:[#allocation7] sm:$0xff]  ;;  %909 = vmatprep.subr.msk.mxu1 %vm416_vm0, %v411_v3  ;;  %v495_v10 = vld [vmem:[%s357_s20] sm:$0xff]  ;;  %v579_v19 = vld [vmem:[#allocation7 + $0x48] sm:$0xff]  ;;  %s923_s12 = sshll.u32 %s1202_s30, 7  ;;  %s398_s22 = scalar_lea.vmem [#allocation8], %s1445_s29 }
  0x81   : > { %v577_v13 = vld [vmem:[#allocation7 + $0x38] sm:$0xff]  ;;  %910 = vmatpush1.msk.msra.mxu1 %vm416_vm0, %v403_v2  ;;  %v933_v14 = vpack.c.bf16 %v572_v9, %v570_v8  ;;  %v574_v16 = vld [vmem:[#allocation7 + $0x20] sm:$0xff]  ;;  %v576_v17 = vld [vmem:[#allocation7 + $0x30] sm:$0xff]  ;;  %932 = vmatprep.subr.bf16.mxu0 %v931_v11  ;;  %s776_s24 = sshll.u32 %s398_s22, 4  ;;  %s1489_s25 = scalar_lea.hbm %s1546_s8, %s923_s12  ;;  %s1491_s24 = int_to_ptr.vmem [resolvable:$true] %s776_s24 }
  0x82   : > { %911 = vmatmul.mubr.msk.f32.vlgmr.msra.gmra.mrb[0].mxu1 %vm412_vm1, %v402_v4  ;;  %926 = vmatprep.subr.mxu1 %v1217_v0  ;;  %v935_v15 = vpack.c.bf16 %v577_v13, %v575_v12  ;;  %v494_v18 = vld [vmem:[%s1543_s5] sm:$0xf]  ;;  %v581_v20 = vld [vmem:[#allocation7 + $0x58] sm:$0xff]  ;;  %v937_v21 = vpack.c.bf16 %v576_v17, %v574_v16  ;;  %v580_v24 = vld [vmem:[#allocation7 + $0x50] sm:$0xff]  ;;  %s760_s20 = scalar_lea.sflag [#allocation4], %s1442_s21  ;;  %s1120_s14 = scalar_lea.vmem %s1491_s24, 128 }
  0x83   : > { %927 = vmatpush3.msra.mxu1 %v495_v10  ;;  %928 = vmatprep.mubr.msk.f32.mxu1 %vm1219_vm2, %v1217_v0  ;;  %v939_v22 = vpack.c.bf16 %v581_v20, %v579_v19  ;;  %v578_v23 = vld [vmem:[#allocation7 + $0x40] sm:$0xff]  ;;  %v583_v26 = vld [vmem:[#allocation7 + $0x68] sm:$0xff]  ;;  %v585_v27 = vld [vmem:[#allocation7 + $0x78] sm:$0xff]  ;;  %p1121_p12 = scmp.ne.s32.totalorder %s1491_s24, %s1120_s14  ;;  %p1576_p0 = scmp.ne.s32.totalorder %s1569_s18, 0 }
  0x84   : > { %934 = vmatpush1.bf16.msra.mxu0 %v933_v14  ;;  %v941_v25 = vpack.c.bf16 %v580_v24, %v578_v23  ;;  %v943_v28 = vpack.c.bf16 %v585_v27, %v583_v26  ;;  %v582_v29 = vld [vmem:[#allocation7 + $0x60] sm:$0xff]  ;;  %v584_v30 = vld [vmem:[#allocation7 + $0x70] sm:$0xff]  ;;  %s1220_s30 = smov [#allocation8]  }
  0x85   : > { %936 = vmatprep.subr.bf16.mxu0 %v935_v15  ;;  %v945_v31 = vpack.c.bf16 %v584_v30, %v582_v29  ;;  %v666_v32 = vld [vmem:[%s1545_s7] sm:$0xf]  ;;  %p1122_p5 = pnand %p1121_p12, %p1576_p0  ;;  %s1124_s29 = sshll.u32 %s1220_s30, 4  ;;  %s1125_s29 = int_to_ptr.vmem [resolvable:$false] %s1124_s29 }
  0x86   : > { %929 = vmatmul.mubr.msk.f32.vlgmr.msra.gmra.mrb[2].mxu1 %vm496_vm3, %v494_v18  ;;  %669 = vperm.xlu0 %1030, %v666_v32   ;;  %v663_v48 = vld [vmem:[%s1544_s6] sm:$0xf]  ;;  %s1126_s2 = scalar_lea.vmem %s1125_s29, 256  ;;  %p1127_p1 = scmp.lt.s32.totalorder %s1491_s24, %s1125_s29 }
  0x87   : > { %745 = vmatprep.mubr.f32.mxu1 %v1217_v0  ;;  %p1123_p9 = pneg %p1122_p5  ;;  %p1128_p2 = scmp.lt.s32.totalorder %s1126_s2, %s1120_s14 }
  0x88   : > { %938 = vmatpush1.bf16.msra.mxu0 %v937_v21 }
  0x89   : > { %940 = vmatprep.subr.bf16.mxu0 %v939_v22  ;;  %p1129_p7 = por %p1128_p2, %p1127_p1 }
  0x8b   : > { %p1130_p4 = pnand %p1129_p7, %p1123_p9 }
  0x8c   : > { %942 = vmatpush1.bf16.msra.mxu0 %v941_v25 }
  0x8d   : > { %944 = vmatprep.subr.bf16.mxu0 %v943_v28 }
  0x90   : > { %946 = vmatpush1.bf16.msra.mxu0 %v945_v31 }
  0xff   : > { %v408_v37 = vpop.permute.xlu0 %407 }
 0x105   : > { %v670_v49 = vpop.permute.xlu0 %669 }
 0x155   : > { %v487_v33 = vpop.f32.mrb[0].mxu1 }
 0x156   : > { %v489_v34 = vpop.f32.mrb[1].mxu1  ;;  %v488_v38 = vadd.f32 %v487_v33, %v408_v37 }
 0x157   : > { %v490_v39 = vadd.f32 %v489_v34, %v408_v37 }
 0x158   : > { %v492_v41 = vmax.f32 %v488_v38, 0.0 }
 0x159   : > { %v566_v35 = vpop.f32.mrb[2].mxu1  ;;  %v493_v44 = vmax.f32 %v490_v39, 0.0 }
 0x15a   : > { %v930_v36 = vpop.f32.mrb[3].mxu1  ;;  %913 = vmatmul.mubr.msk.f32.vlgmr.msra.gmra.mrb[0].mxu0 %vm586_vm4, %v566_v35 }
 0x22d   : > { %v656_v40 = vpop.f32.mrb[0].mxu0 }
 0x22e   : > { %v661_v42 = vmax.f32 %v656_v40, 0.0  ;;  %v658_v43 = vpop.f32.mrb[1].mxu0 }
 0x22f   : > { %v662_v45 = vmax.f32 %v658_v43, 0.0 }
 0x230   : > { %v664_v46 = vadd.f32 %v661_v42, %v492_v41 }
 0x231   : > { %v665_v47 = vadd.f32 %v662_v45, %v493_v44 }
 0x233   : > { %914 = vmatprep.subr.msk.mxu1 %vm416_vm0, %v665_v47 }
 0x234   : > { %915 = vmatpush1.msk.msra.mxu1 %vm416_vm0, %v664_v46 }
 0x235   : > { %916 = vmatmul.mubr.msk.f32.vlgmr.msra.gmra.mrb[4].mxu1 %vm412_vm1, %v663_v48 }
 0x308   : > { %v747_v50 = vpop.f32.mrb[4].mxu1 }
 0x309   : > { %v748_v51 = vadd.f32 %v747_v50, %v670_v49  ;;  %v749_v52 = vpop.f32.mrb[5].mxu1 }
 0x30a   : > { %v750_v53 = vadd.f32 %v749_v52, %v670_v49 }
 0x30b   : > { %v752_v54 = vmax.f32 %v748_v51, 0.0 }
 0x30c   : > { %v753_v55 = vmax.f32 %v750_v53, 0.0 }
 0x30e   : > { %v756_v56 = vcombine.low %v752_v54, %v753_v55 }
 0x310   : > { %758 = vst [vmem:[%s398_s22] sm:$0xff] %v756_v56 }
 0x311   : > { %1133 = shalt.err (!%p1130_p4)
}
 0x312   : > { %s1134_s21 = scalar_lea.hbm %s1489_s25, 128  ;;  %s1138_s11 = scalar_lea.hbm %s1546_s8, 256 }
 0x313   : > { %p1135_p8 = scmp.ne.s32.totalorder %s1489_s25, %s1134_s21  ;;  %p1139_p10 = scmp.lt.u32.totalorder %s1489_s25, %s1546_s8 }
 0x314   : > { %p1140_p13 = scmp.lt.u32.totalorder %s1138_s11, %s1134_s21  ;;  %p1142_p12 = scmp.lt.u32.totalorder %s1134_s21, %s1489_s25 }
 0x315   : > { %p1136_p11 = pnand %p1135_p8, %p1576_p0 }
 0x316   : > { %p1141_p3 = por %p1140_p13, %p1139_p10 }
 0x317   : > { %p1137_p6 = pneg %p1136_p11 }
 0x318   : > { %p1143_p5 = por %p1142_p12, %p1141_p3 }
 0x31a   : > { %p1144_p9 = pnand %p1143_p5, %p1137_p6 }
 0x31c   : > { %1147 = shalt.err (!%p1144_p9)
}
 0x31d   : > { %955 = dma.vmem_to_hbm [thread:$0]  (%p1576_p0), %s1491_s24, 128, %s1489_s25, %s760_s20  }
 0x31e PF: > { %s1577_s27 = sld [smem:[#allocation13_spill]]  ;;  %s1578_s19 = sld [smem:[#allocation16_spill]] }
 0x31f   : > { %p1580_p2 = scmp.ge.s32.totalorder %s1210_s10, 2 }
 0x324   : > { %s788_s26 = sand.u32 1, %s1577_s27   ;;  %p1579_p1 = scmp.ne.s32.totalorder %s1578_s19, 0 }
 0x325   : > { %s789_s12 = scalar_lea.sflag [#allocation4], %s788_s26 }
 0x326   : > { %p969_p7 = pnand %p1580_p2, %p1579_p1 }
 0x328   : > { %1185 = dma.done.wait (!%p969_p7), %s789_s12, 128  }
 0x329   : > { %1187 = vsyncadd (!%p969_p7), %s789_s12, 4294967168  ;;  %s27_s10 = sadd.s32 1, %s1210_s10   ;;  %s1581_s22 = sld [smem:[#allocation14_spill]] }
 0x32a   : > { %p24_p4 = scmp.ge.s32.totalorder %s27_s10, 4   ;;  %s1582_s29 = sld [smem:[#allocation18_spill]] }
 0x32b   : > { %s1583_s30 = sld [smem:[#allocation15_spill]]  ;;  %s1584_s9 = sld [smem:[#allocation17_spill]] }
 0x32c   : > { %s1585_s27 = smov %s1194_s28  ;;  %26 = sbr.rel (!%p24_p4) target bundleno = 10 (0xa), region = 115 }
 0x32f   : > { %s1586_s28 = smov %s1581_s22 }
 0x333   :  { %794 = vsyncpa [#allocation3], 1 }
 0x334   :  { %796 = vsyncpa [#allocation3 + $0x1], 1 }
 0x335   :  { %797 = vsyncpa [#allocation6], 1 }
 0x336   :  { %799 = vsyncpa [#allocation6 + $0x1], 1 }
 0x337   :  { %800 = vsyncpa [#allocation4], 1 }
 0x338   :  { %802 = vsyncpa [#allocation4 + $0x1], 1 }

</bundles_post_ra>
